<compile_context>
chip_gen: v5e
topology: v5e:2x2
jax: 0.10.0
libtpu: 0.0.40
codegen_flags: <defaults>
</compile_context>

<pallas_src>
import functools
import math

import numpy as np
import jax
import jax.numpy as jnp
from jax import lax
from jax.experimental import pallas as pl
from jax.experimental.pallas import tpu as pltpu


# ----------------------------- kernel -----------------------------

def _rscs_kernel(x_ref, w1b_ref, b1b_ref, w2_ref, b2_ref,
                 fc1w_ref, fc1b_ref, fc2w_ref, fc2b_ref,
                 mean_ref, exp_ref, o_ref, *, L_pad, L_real):
    x = x_ref[...]                                         # (Cin, N) compute dtype, N = Bt*L_pad
    N = x.shape[1]
    cd = x.dtype

    # Hoisted per-position boundary masks (shared by both stack3 calls — JAX does not CSE
    # the broadcast+compare, so build them exactly once).
    col = lax.broadcasted_iota(jnp.int32, (1, N), 1) % L_pad
    m0 = col == 0                      # first position of every sample
    mL = col == L_real - 1             # last *real* position of every sample (pad-safe)

    def stack3(a):
        # taps a[:, l-1] / a[:, l+1] via XLU rolls, zeroed at per-sample boundaries
        a_m1 = jnp.where(m0, jnp.zeros_like(a), pltpu.roll(a, 1, axis=1))
        a_p1 = jnp.where(mL, jnp.zeros_like(a), pltpu.roll(a, N - 1, axis=1))
        return jnp.concatenate([a_m1, a, a_p1], axis=0)    # (3*rows, N)

    C = w2_ref.shape[0]

    # Fused [conv1 (BN1 folded) ; shortcut 1x1 (BN folded)]: one MXU push, M = 2C rows
    # streamed per stationary weight tile instead of two small-M passes.
    y = (jnp.dot(w1b_ref[...], stack3(x), preferred_element_type=jnp.float32)
         + b1b_ref[...])                                   # (2C, N) f32
    h1 = jnp.maximum(y[:C], 0.0)                           # relu(bn1(conv1(x)))
    res = y[C:]                                            # bn_sc(conv1x1(x)) — no relu

    # conv2 (BN2 scale folded) -> bias : one MXU push, K = 3*C
    out2 = (jnp.dot(w2_ref[...], stack3(h1.astype(cd)),
                    preferred_element_type=jnp.float32) + b2_ref[...])   # (C, N) f32

    # Fused per-sample GAP / abs-mean: one (2C, N) @ (N, Bt) matmul (mean matrix already
    # excludes padded positions and divides by the real length).
    cat2 = jnp.concatenate([out2, jnp.abs(out2)], axis=0)                # (2C, N)
    means = jnp.dot(cat2, mean_ref[...], preferred_element_type=jnp.float32)  # (2C, Bt)
    gap, absmean = means[:C], means[C:]

    # Channel-shared threshold MLP (tiny — kept in f32 for accuracy).
    h = jnp.maximum(
        jnp.dot(fc1w_ref[...], gap, preferred_element_type=jnp.float32) + fc1b_ref[...],
        0.0)                                               # (C//r, Bt)
    g = jax.nn.sigmoid(
        jnp.dot(fc2w_ref[...], h, preferred_element_type=jnp.float32) + fc2b_ref[...])  # (G, Bt)
    G = g.shape[0]
    # thr[c] = g[c % G] * absmean[c]   (torch unsqueeze+repeat+reshape == tile semantics)
    thr = jnp.tile(g, (C // G, 1)) * absmean               # (C, Bt)
    # TODO(synk): for large Bt this broadcast matmul could become a per-sample lane
    # broadcast loop; at the small Bt chosen here the (Bt, N) expand matrix is tiny.
    thr_full = jnp.dot(thr, exp_ref[...], preferred_element_type=jnp.float32)  # (C, N)

    # Soft-threshold via the clip identity: sign(x)*relu(|x|-t) == x - clip(x, -t, t), t >= 0.
    soft = out2 - jnp.clip(out2, -thr_full, thr_full)

    o_ref[...] = jnp.maximum(soft + res, 0.0).astype(o_ref.dtype)


# ----------------------------- tiling / wrapper -----------------------------

def _choose_tiling(B, L, Cin, C, itemsize, vmem_budget=40 << 20):
    """Pick (Bt samples per grid step, padded per-sample length L_pad).

    Constraints: B % Bt == 0, (Bt * L_pad) % 128 == 0 (lane-dense, unmasked stores),
    the per-step working set fits a conservative VMEM budget (safe on v7x's 64 MiB/TC),
    and nb = B // Bt >= 2 whenever possible so both v7x TensorCores get work.
    """
    per_lane = itemsize * (4 * Cin + 4 * C) + 4 * 9 * C     # stacks + f32 epilogue temps
    max_lanes = max(128, vmem_budget // (3 * per_lane))     # headroom for double-buffered I/O

    def lane_pad(bt):
        step = 128 // math.gcd(bt, 128)
        return -(-L // step) * step

    feasible = []
    for bt in range(1, B + 1):
        if B % bt:
            continue
        lp = lane_pad(bt)
        if bt * lp <= max_lanes:
            feasible.append((bt, lp))
    if not feasible:
        # TODO(synk): very long sequences would additionally need L-tiling of the grid.
        return 1, lane_pad(1)

    def score(cand):
        bt, lp = cand
        nb = B // bt
        # prefer: both TCs busy (nb >= 2) > more lanes per step > less padding waste
        return (1 if (B < 2 or nb >= 2) else 0, bt * lp, -lp)

    return max(feasible, key=score)


def residual_shrinkage_cs(x, kp):
    """x: (B, Cin, L) f32; kp: packed kernel params (see pack_for_kernel)."""
    B, Cin, L = x.shape
    C = kp["w2f"].shape[0]
    Cr = kp["fc1_b"].shape[0]
    G = kp["fc2_b"].shape[0]
    cd = kp["w1big"].dtype
    itemsize = jnp.dtype(cd).itemsize
    assert C % G == 0, "out_channels must be divisible by groups"

    Bt, L_pad = _choose_tiling(B, L, Cin, C, itemsize)
    nb = B // Bt
    N = Bt * L_pad
    assert B % Bt == 0 and N % 128 == 0

    # zero-pad each sample to L_pad and lay out lane-dense: (Cin, B*L_pad)
    xp = jnp.pad(x, ((0, 0), (0, 0), (0, L_pad - L)))
    x2d = jnp.transpose(xp, (1, 0, 2)).reshape(Cin, B * L_pad).astype(cd)

    # per-sample averaging / broadcast matrices (padded positions excluded from the means)
    eye = jnp.eye(Bt, dtype=jnp.float32)
    valid = (jnp.arange(L_pad) < L).astype(jnp.float32) / float(L)
    mean_mat = jnp.repeat(eye, L_pad, axis=0) * jnp.tile(valid, Bt)[:, None]   # (N, Bt)
    exp_mat = jnp.repeat(eye, L_pad, axis=1)                                   # (Bt, N)

    def full(a):
        return pl.BlockSpec(a.shape, lambda i, _n=a.ndim: (0,) * _n)

    consts = (kp["w1big"], kp["b1big"], kp["w2f"], kp["bn2_b"],
              kp["fc1_w"], kp["fc1_b"], kp["fc2_w"], kp["fc2_b"])
    param_bytes = sum(int(v.size) * jnp.dtype(v.dtype).itemsize for v in consts)
    param_bytes += int(mean_mat.size) * 4 + int(exp_mat.size) * 4
    temp_bytes = N * (itemsize * (3 * Cin + 3 * C) + 4 * 9 * C)
    need = 2 * (param_bytes + Cin * N * itemsize + C * N * 4) + temp_bytes
    # Never request the full 64 MiB of a v7x TensorCore; cap at 48 MiB.
    vmem_limit = int(min(max(int(need * 1.5), 32 << 20), 48 << 20))

    flops = (2 * B * L_pad * (2 * C * 3 * Cin + 3 * C * C + 3 * C * Bt)
             + 2 * B * (Cr * C + G * Cr) + 10 * B * C * L_pad)
    bytes_accessed = int(itemsize * B * L_pad * Cin + 4 * B * L_pad * C + nb * param_bytes)

    # NOTE: the grid-invariant parameter blocks could be single-buffered
    # (pipeline_mode=pl.Buffered(1)) to shave VMEM on v7x at large C; they are tiny
    # relative to the activation slabs at these shapes, so defaults are kept.
    out2d = pl.pallas_call(
        functools.partial(_rscs_kernel, L_pad=L_pad, L_real=L),
        out_shape=jax.ShapeDtypeStruct((C, B * L_pad), jnp.float32),
        grid=(nb,),
        in_specs=[
            pl.BlockSpec((Cin, N), lambda i: (0, i)),      # x slab (Bt samples per step)
            full(kp["w1big"]), full(kp["b1big"]),          # fused conv1+shortcut weights/biases
            full(kp["w2f"]), full(kp["bn2_b"]),            # conv2 (BN2 folded) + bias
            full(kp["fc1_w"]), full(kp["fc1_b"]),          # threshold FC1
            full(kp["fc2_w"]), full(kp["fc2_b"]),          # threshold FC2
            full(mean_mat), full(exp_mat),                 # per-sample mean / broadcast
        ],
        out_specs=pl.BlockSpec((C, N), lambda i: (0, i)),
        compiler_params=pltpu.CompilerParams(
            dimension_semantics=("parallel",),
            vmem_limit_bytes=vmem_limit,
        ),
        cost_estimate=pl.CostEstimate(
            flops=flops, transcendentals=B * G, bytes_accessed=bytes_accessed),
    )(x2d, kp["w1big"], kp["b1big"], kp["w2f"], kp["bn2_b"],
      kp["fc1_w"], kp["fc1_b"], kp["fc2_w"], kp["fc2_b"],
      mean_mat, exp_mat)

    # layout plumbing back to (B, C, L): strip the per-sample padding
    return jnp.transpose(out2d.reshape(C, B, L_pad), (1, 0, 2))[:, :, :L]


# ----------------------------- parameter setup (deterministic) -----------------------------

def init_params(key, cin, c, g, reduction):
    eps = 1e-5
    cr = c // reduction
    ks = jax.random.split(key, 20)

    def bn_fold(k0, k1, k2, k3, n):
        gamma = jax.random.uniform(ks[k0], (n,), minval=0.5, maxval=1.5)
        beta = jax.random.normal(ks[k1], (n,)) * 0.1
        mean = jax.random.normal(ks[k2], (n,)) * 0.1
        var = jax.random.uniform(ks[k3], (n,), minval=0.5, maxval=1.5)
        scale = gamma / jnp.sqrt(var + eps)
        shift = beta - mean * scale
        return scale.astype(jnp.float32), shift.astype(jnp.float32)

    p = {}
    p["w1_t"] = (jax.random.normal(ks[0], (c, cin, 3)) * 0.3).astype(jnp.float32)   # torch (Co,Ci,K)
    p["w2_t"] = (jax.random.normal(ks[1], (c, c, 3)) * 0.2).astype(jnp.float32)
    p["wsc_t"] = (jax.random.normal(ks[2], (c, cin, 1)) * 0.3).astype(jnp.float32)
    p["bn1_s"], p["bn1_b"] = bn_fold(3, 4, 5, 6, c)
    p["bn2_s"], p["bn2_b"] = bn_fold(7, 8, 9, 10, c)
    p["sc_s"], p["sc_b"] = bn_fold(11, 12, 13, 14, c)
    p["fc1_w"] = (jax.random.normal(ks[15], (cr, c)) * 0.3).astype(jnp.float32)
    p["fc1_b"] = (jax.random.normal(ks[16], (cr,)) * 0.1).astype(jnp.float32)
    p["fc2_w"] = (jax.random.normal(ks[17], (g, cr)) * 0.3).astype(jnp.float32)
    p["fc2_b"] = (jax.random.normal(ks[18], (g,)) * 0.1).astype(jnp.float32)
    return p


def pack_for_kernel(p, compute_dtype=jnp.float32):
    """Fuse 3-tap conv weights to (Co, 3*Ci), fold BN scales, fuse shortcut into conv1.

    compute_dtype=jnp.bfloat16 is recommended on v6e/v7x (MXU bf16-native, halves
    activation VMEM/HBM); accumulation stays f32 inside the kernel.  fp8 is NOT a
    drop-in replacement for these weights — stick with bf16 on v7x.
    """
    col = lambda v: v.reshape(-1, 1).astype(jnp.float32)

    def fuse3(w_t, scale):                       # w_t: torch layout (Co, Ci, 3)
        wf = jnp.concatenate([w_t[:, :, 0], w_t[:, :, 1], w_t[:, :, 2]], axis=1)  # (Co, 3*Ci)
        return scale[:, None] * wf

    c, cin, _ = p["w1_t"].shape
    w1f = fuse3(p["w1_t"], p["bn1_s"])                                    # (C, 3*Cin)
    wsc = p["sc_s"][:, None] * p["wsc_t"][:, :, 0]                        # (C, Cin)
    z = jnp.zeros((c, cin), jnp.float32)
    wsc3 = jnp.concatenate([z, wsc, z], axis=1)                           # center-tap-only
    w1big = jnp.concatenate([w1f, wsc3], axis=0).astype(compute_dtype)    # (2C, 3*Cin)
    b1big = jnp.concatenate([col(p["bn1_b"]), col(p["sc_b"])], axis=0)    # (2C, 1) f32

    return {
        "w1big": w1big, "b1big": b1big,
        "w2f": fuse3(p["w2_t"], p["bn2_s"]).astype(compute_dtype), "bn2_b": col(p["bn2_b"]),
        "fc1_w": p["fc1_w"].astype(jnp.float32), "fc1_b": col(p["fc1_b"]),
        "fc2_w": p["fc2_w"].astype(jnp.float32), "fc2_b": col(p["fc2_b"]),
    }


# ----------------------------- pure-JAX reference -----------------------------

def reference(x, p, g):
    def conv1d(a, w, pad):
        return lax.conv_general_dilated(a, w, window_strides=(1,), padding=((pad, pad),),
                                        dimension_numbers=("NCH", "OIH", "NCH"))

    bn = lambda a, s, b: s[None, :, None] * a + b[None, :, None]
    res = bn(conv1d(x, p["wsc_t"], 0), p["sc_s"], p["sc_b"])
    out = jax.nn.relu(bn(conv1d(x, p["w1_t"], 1), p["bn1_s"], p["bn1_b"]))
    out = bn(conv1d(out, p["w2_t"], 1), p["bn2_s"], p["bn2_b"])
    B, C, L = out.shape
    gap = out.mean(-1)                                               # (B, C)
    h = jax.nn.relu(gap @ p["fc1_w"].T + p["fc1_b"])
    gg = jax.nn.sigmoid(h @ p["fc2_w"].T + p["fc2_b"])               # (B, G)
    thr = jnp.tile(gg, (1, C // g))[:, :, None] * jnp.abs(out).mean(-1, keepdims=True)
    out = jnp.sign(out) * jax.nn.relu(jnp.abs(out) - thr)
    return jax.nn.relu(out + res)


if __name__ == "__main__":
    B, Cin, C, L, G, RED = 4, 8, 16, 32, 4, 4          # stride=1, Cin != C -> conv shortcut
    key = jax.random.PRNGKey(0)
    kx, kparam = jax.random.split(key)
    x = jax.random.normal(kx, (B, Cin, L), dtype=jnp.float32)
    params = init_params(kparam, Cin, C, G, RED)
    ref = reference(x, params, G)

    # f32 path (exact check) — valid on every TPU generation.
    out = jax.block_until_ready(
        residual_shrinkage_cs(x, pack_for_kernel(params, jnp.float32)))
    np.testing.assert_allclose(np.asarray(out), np.asarray(ref), rtol=5e-5, atol=5e-5)

    # bf16 compute path (recommended on v6e / v7x: MXU-native, half the activation traffic).
    out_bf16 = jax.block_until_ready(
        residual_shrinkage_cs(x, pack_for_kernel(params, jnp.bfloat16)))
    np.testing.assert_allclose(np.asarray(out_bf16), np.asarray(ref), rtol=5e-2, atol=5e-2)

    print("KERNEL_OK")
</pallas_src>

<mosaic_0001>
module attributes {stable_mosaic.version = 11 : i64} {
  func.func @_rscs_kernel(%arg0: i32, %arg1: memref<8x128xf32, #tpu.memory_space<vmem>>, %arg2: memref<32x24xf32, #tpu.memory_space<vmem>>, %arg3: memref<32x1xf32, #tpu.memory_space<vmem>>, %arg4: memref<16x48xf32, #tpu.memory_space<vmem>>, %arg5: memref<16x1xf32, #tpu.memory_space<vmem>>, %arg6: memref<4x16xf32, #tpu.memory_space<vmem>>, %arg7: memref<4x1xf32, #tpu.memory_space<vmem>>, %arg8: memref<4x4xf32, #tpu.memory_space<vmem>>, %arg9: memref<4x1xf32, #tpu.memory_space<vmem>>, %arg10: memref<128x2xf32, #tpu.memory_space<vmem>>, %arg11: memref<2x128xf32, #tpu.memory_space<vmem>>, %arg12: memref<16x128xf32, #tpu.memory_space<vmem>>) attributes {dimension_semantics = [#tpu.dimension_semantics<parallel>], iteration_bounds = array<i64: 2>, scalar_prefetch = 0 : i64, scratch_operands = 0 : i64, tpu.core_type = #tpu.core_type<tc>, window_params = [{transform_indices = @transform_0, window_bounds = array<i64: 8, 128>}, {pipeline_mode = #tpu.pipeline_mode<synchronous>, transform_indices = @transform_1, window_bounds = array<i64: 32, 24>}, {pipeline_mode = #tpu.pipeline_mode<synchronous>, transform_indices = @transform_2, window_bounds = array<i64: 32, 1>}, {pipeline_mode = #tpu.pipeline_mode<synchronous>, transform_indices = @transform_3, window_bounds = array<i64: 16, 48>}, {pipeline_mode = #tpu.pipeline_mode<synchronous>, transform_indices = @transform_4, window_bounds = array<i64: 16, 1>}, {pipeline_mode = #tpu.pipeline_mode<synchronous>, transform_indices = @transform_5, window_bounds = array<i64: 4, 16>}, {pipeline_mode = #tpu.pipeline_mode<synchronous>, transform_indices = @transform_6, window_bounds = array<i64: 4, 1>}, {pipeline_mode = #tpu.pipeline_mode<synchronous>, transform_indices = @transform_7, window_bounds = array<i64: 4, 4>}, {pipeline_mode = #tpu.pipeline_mode<synchronous>, transform_indices = @transform_8, window_bounds = array<i64: 4, 1>}, {pipeline_mode = #tpu.pipeline_mode<synchronous>, transform_indices = @transform_9, window_bounds = array<i64: 128, 2>}, {pipeline_mode = #tpu.pipeline_mode<synchronous>, transform_indices = @transform_10, window_bounds = array<i64: 2, 128>}, {transform_indices = @transform_11, window_bounds = array<i64: 16, 128>}]} {
    %c0 = arith.constant 0 : index
    %c0_0 = arith.constant 0 : index
    %0 = vector.load %arg1[%c0, %c0_0] : memref<8x128xf32, #tpu.memory_space<vmem>>, vector<8x128xf32>
    %1 = tpu.iota {dimensions = array<i32: 1>} : vector<1x128xi32>
    %c64_i32 = arith.constant 64 : i32
    %c0_i32 = arith.constant 0 : i32
    %2 = arith.cmpi eq, %c64_i32, %c0_i32 : i32
    %c1_i32 = arith.constant 1 : i32
    %3 = arith.select %2, %c1_i32, %c64_i32 : i32
    %4 = vector.broadcast %3 : i32 to vector<1x128xi32>
    %5 = arith.remsi %1, %4 : vector<1x128xi32>
    %c0_i32_1 = arith.constant 0 : i32
    %6 = vector.broadcast %c0_i32_1 : i32 to vector<1x128xi32>
    %7 = arith.cmpi ne, %5, %6 : vector<1x128xi32>
    %c0_i32_2 = arith.constant 0 : i32
    %8 = vector.broadcast %c0_i32_2 : i32 to vector<1x128xi32>
    %9 = arith.cmpi slt, %5, %8 : vector<1x128xi32>
    %c0_i32_3 = arith.constant 0 : i32
    %10 = arith.cmpi slt, %3, %c0_i32_3 : i32
    %11 = vector.broadcast %10 : i1 to vector<1x128xi1>
    %12 = vector.broadcast %11 : vector<1x128xi1> to vector<1x128xi1>
    %13 = arith.xori %9, %12 : vector<1x128xi1>
    %14 = arith.andi %13, %7 : vector<1x128xi1>
    %15 = vector.broadcast %3 : i32 to vector<1x128xi32>
    %16 = arith.addi %5, %15 : vector<1x128xi32>
    %17 = arith.select %14, %16, %5 : vector<1x128xi1>, vector<1x128xi32>
    %c0_i32_4 = arith.constant 0 : i32
    %18 = vector.broadcast %c0_i32_4 : i32 to vector<1x128xi32>
    %19 = arith.cmpi eq, %17, %18 : vector<1x128xi32>
    %c31_i32 = arith.constant 31 : i32
    %20 = vector.broadcast %c31_i32 : i32 to vector<1x128xi32>
    %21 = arith.cmpi eq, %17, %20 : vector<1x128xi32>
    %c0_5 = arith.constant 0 : index
    %c0_6 = arith.constant 0 : index
    %22 = vector.load %arg2[%c0_5, %c0_6] : memref<32x24xf32, #tpu.memory_space<vmem>>, vector<32x24xf32>
    %cst = arith.constant 0.000000e+00 : f32
    %23 = vector.broadcast %cst : f32 to vector<8x128xf32>
    %c1_i32_7 = arith.constant 1 : i32
    %24 = tpu.dynamic_rotate %0 by %c1_i32_7 dim 1 : vector<8x128xf32>, i32 -> vector<8x128xf32>
    %25 = vector.shape_cast %19 : vector<1x128xi1> to vector<1x128xi1>
    %26 = vector.broadcast %25 : vector<1x128xi1> to vector<8x128xi1>
    %27 = arith.select %26, %23, %24 : vector<8x128xi1>, vector<8x128xf32>
    %cst_8 = arith.constant 0.000000e+00 : f32
    %28 = vector.broadcast %cst_8 : f32 to vector<8x128xf32>
    %c127_i32 = arith.constant 127 : i32
    %29 = tpu.dynamic_rotate %0 by %c127_i32 dim 1 : vector<8x128xf32>, i32 -> vector<8x128xf32>
    %30 = vector.shape_cast %21 : vector<1x128xi1> to vector<1x128xi1>
    %31 = vector.broadcast %30 : vector<1x128xi1> to vector<8x128xi1>
    %32 = arith.select %31, %28, %29 : vector<8x128xi1>, vector<8x128xf32>
    %33 = tpu.concatenate %27, %0, %32 in 0 : vector<8x128xf32>, vector<8x128xf32>, vector<8x128xf32> -> vector<24x128xf32>
    %cst_9 = arith.constant dense<0.000000e+00> : vector<32x128xf32>
    %34 = tpu.matmul %22, %33, %cst_9 {dimension_numbers = #tpu.dot_dimension_numbers<[1], [0], [0], [1], [0, 0, 1, 1], [], []>} : vector<32x24xf32>, vector<24x128xf32>, vector<32x128xf32> -> vector<32x128xf32>
    %c0_10 = arith.constant 0 : index
    %c0_11 = arith.constant 0 : index
    %35 = vector.load %arg3[%c0_10, %c0_11] : memref<32x1xf32, #tpu.memory_space<vmem>>, vector<32x1xf32>
    %36 = vector.broadcast %35 : vector<32x1xf32> to vector<32x128xf32>
    %37 = arith.addf %34, %36 : vector<32x128xf32>
    %38 = vector.extract_strided_slice %37 {offsets = [0, 0], sizes = [16, 128], strides = [1, 1]} : vector<32x128xf32> to vector<16x128xf32>
    %cst_12 = arith.constant 0.000000e+00 : f32
    %39 = vector.broadcast %cst_12 : f32 to vector<16x128xf32>
    %40 = arith.maximumf %38, %39 : vector<16x128xf32>
    %41 = vector.extract_strided_slice %37 {offsets = [16, 0], sizes = [16, 128], strides = [1, 1]} : vector<32x128xf32> to vector<16x128xf32>
    %c0_13 = arith.constant 0 : index
    %c0_14 = arith.constant 0 : index
    %42 = vector.load %arg4[%c0_13, %c0_14] : memref<16x48xf32, #tpu.memory_space<vmem>>, vector<16x48xf32>
    %cst_15 = arith.constant 0.000000e+00 : f32
    %43 = vector.broadcast %cst_15 : f32 to vector<16x128xf32>
    %c1_i32_16 = arith.constant 1 : i32
    %44 = tpu.dynamic_rotate %40 by %c1_i32_16 dim 1 : vector<16x128xf32>, i32 -> vector<16x128xf32>
    %45 = vector.shape_cast %19 : vector<1x128xi1> to vector<1x128xi1>
    %46 = vector.broadcast %45 : vector<1x128xi1> to vector<16x128xi1>
    %47 = arith.select %46, %43, %44 : vector<16x128xi1>, vector<16x128xf32>
    %cst_17 = arith.constant 0.000000e+00 : f32
    %48 = vector.broadcast %cst_17 : f32 to vector<16x128xf32>
    %c127_i32_18 = arith.constant 127 : i32
    %49 = tpu.dynamic_rotate %40 by %c127_i32_18 dim 1 : vector<16x128xf32>, i32 -> vector<16x128xf32>
    %50 = vector.shape_cast %21 : vector<1x128xi1> to vector<1x128xi1>
    %51 = vector.broadcast %50 : vector<1x128xi1> to vector<16x128xi1>
    %52 = arith.select %51, %48, %49 : vector<16x128xi1>, vector<16x128xf32>
    %53 = tpu.concatenate %47, %40, %52 in 0 : vector<16x128xf32>, vector<16x128xf32>, vector<16x128xf32> -> vector<48x128xf32>
    %cst_19 = arith.constant dense<0.000000e+00> : vector<16x128xf32>
    %54 = tpu.matmul %42, %53, %cst_19 {dimension_numbers = #tpu.dot_dimension_numbers<[1], [0], [0], [1], [0, 0, 1, 1], [], []>} : vector<16x48xf32>, vector<48x128xf32>, vector<16x128xf32> -> vector<16x128xf32>
    %c0_20 = arith.constant 0 : index
    %c0_21 = arith.constant 0 : index
    %55 = vector.load %arg5[%c0_20, %c0_21] : memref<16x1xf32, #tpu.memory_space<vmem>>, vector<16x1xf32>
    %56 = vector.broadcast %55 : vector<16x1xf32> to vector<16x128xf32>
    %57 = arith.addf %54, %56 : vector<16x128xf32>
    %58 = math.absf %57 : vector<16x128xf32>
    %59 = tpu.concatenate %57, %58 in 0 : vector<16x128xf32>, vector<16x128xf32> -> vector<32x128xf32>
    %c0_22 = arith.constant 0 : index
    %c0_23 = arith.constant 0 : index
    %60 = vector.load %arg10[%c0_22, %c0_23] : memref<128x2xf32, #tpu.memory_space<vmem>>, vector<128x2xf32>
    %cst_24 = arith.constant dense<0.000000e+00> : vector<32x2xf32>
    %61 = tpu.matmul %59, %60, %cst_24 {dimension_numbers = #tpu.dot_dimension_numbers<[1], [0], [0], [1], [0, 0, 1, 1], [], []>} : vector<32x128xf32>, vector<128x2xf32>, vector<32x2xf32> -> vector<32x2xf32>
    %62 = vector.extract_strided_slice %61 {offsets = [0, 0], sizes = [16, 2], strides = [1, 1]} : vector<32x2xf32> to vector<16x2xf32>
    %63 = vector.extract_strided_slice %61 {offsets = [16, 0], sizes = [16, 2], strides = [1, 1]} : vector<32x2xf32> to vector<16x2xf32>
    %c0_25 = arith.constant 0 : index
    %c0_26 = arith.constant 0 : index
    %64 = vector.load %arg6[%c0_25, %c0_26] : memref<4x16xf32, #tpu.memory_space<vmem>>, vector<4x16xf32>
    %cst_27 = arith.constant dense<0.000000e+00> : vector<4x2xf32>
    %65 = tpu.matmul %64, %62, %cst_27 {dimension_numbers = #tpu.dot_dimension_numbers<[1], [0], [0], [1], [0, 0, 1, 1], [], []>} : vector<4x16xf32>, vector<16x2xf32>, vector<4x2xf32> -> vector<4x2xf32>
    %c0_28 = arith.constant 0 : index
    %c0_29 = arith.constant 0 : index
    %66 = vector.load %arg7[%c0_28, %c0_29] : memref<4x1xf32, #tpu.memory_space<vmem>>, vector<4x1xf32>
    %67 = vector.broadcast %66 : vector<4x1xf32> to vector<4x2xf32>
    %68 = arith.addf %65, %67 : vector<4x2xf32>
    %cst_30 = arith.constant 0.000000e+00 : f32
    %69 = vector.broadcast %cst_30 : f32 to vector<4x2xf32>
    %70 = arith.maximumf %68, %69 : vector<4x2xf32>
    %c0_31 = arith.constant 0 : index
    %c0_32 = arith.constant 0 : index
    %71 = vector.load %arg8[%c0_31, %c0_32] : memref<4x4xf32, #tpu.memory_space<vmem>>, vector<4x4xf32>
    %cst_33 = arith.constant dense<0.000000e+00> : vector<4x2xf32>
    %72 = tpu.matmul %71, %70, %cst_33 {dimension_numbers = #tpu.dot_dimension_numbers<[1], [0], [0], [1], [0, 0, 1, 1], [], []>} : vector<4x4xf32>, vector<4x2xf32>, vector<4x2xf32> -> vector<4x2xf32>
    %c0_34 = arith.constant 0 : index
    %c0_35 = arith.constant 0 : index
    %73 = vector.load %arg9[%c0_34, %c0_35] : memref<4x1xf32, #tpu.memory_space<vmem>>, vector<4x1xf32>
    %74 = vector.broadcast %73 : vector<4x1xf32> to vector<4x2xf32>
    %75 = arith.addf %72, %74 : vector<4x2xf32>
    %76 = arith.negf %75 : vector<4x2xf32>
    %77 = math.exp %76 : vector<4x2xf32>
    %cst_36 = arith.constant 1.000000e+00 : f32
    %78 = vector.broadcast %cst_36 : f32 to vector<4x2xf32>
    %79 = arith.addf %78, %77 : vector<4x2xf32>
    %80 = arith.divf %78, %79 : vector<4x2xf32>
    %81 = tpu.concatenate %80, %80, %80, %80 in 0 : vector<4x2xf32>, vector<4x2xf32>, vector<4x2xf32>, vector<4x2xf32> -> vector<16x2xf32>
    %82 = arith.mulf %81, %63 : vector<16x2xf32>
    %c0_37 = arith.constant 0 : index
    %c0_38 = arith.constant 0 : index
    %83 = vector.load %arg11[%c0_37, %c0_38] : memref<2x128xf32, #tpu.memory_space<vmem>>, vector<2x128xf32>
    %cst_39 = arith.constant dense<0.000000e+00> : vector<16x128xf32>
    %84 = tpu.matmul %82, %83, %cst_39 {dimension_numbers = #tpu.dot_dimension_numbers<[1], [0], [0], [1], [0, 0, 1, 1], [], []>} : vector<16x2xf32>, vector<2x128xf32>, vector<16x128xf32> -> vector<16x128xf32>
    %cst_40 = arith.constant 0.000000e+00 : f32
    %85 = vector.broadcast %cst_40 : f32 to vector<16x128xf32>
    %86 = arith.subf %85, %84 : vector<16x128xf32>
    %87 = arith.maximumf %86, %57 : vector<16x128xf32>
    %88 = arith.minimumf %84, %87 : vector<16x128xf32>
    %89 = arith.subf %57, %88 : vector<16x128xf32>
    %90 = arith.addf %89, %41 : vector<16x128xf32>
    %cst_41 = arith.constant 0.000000e+00 : f32
    %91 = vector.broadcast %cst_41 : f32 to vector<16x128xf32>
    %92 = arith.maximumf %90, %91 : vector<16x128xf32>
    %c0_42 = arith.constant 0 : index
    %c0_43 = arith.constant 0 : index
    %93 = vector.load %arg12[%c0_42, %c0_43] : memref<16x128xf32, #tpu.memory_space<vmem>>, vector<16x128xf32>
    tpu.vector_store %arg12[%c0_42, %c0_43], %92 {strides = array<i32>} : memref<16x128xf32, #tpu.memory_space<vmem>>, vector<16x128xf32>,
    return
  }
  func.func @transform_0(%arg0: i32) -> (i32, i32) {
    %c0_i32 = arith.constant 0 : i32
    %c0_i32_0 = arith.constant 0 : i32
    return %c0_i32, %arg0 : i32, i32
  }
  func.func @transform_1(%arg0: i32) -> (i32, i32) {
    %c0_i32 = arith.constant 0 : i32
    %c0_i32_0 = arith.constant 0 : i32
    %c0_i32_1 = arith.constant 0 : i32
    return %c0_i32, %c0_i32_0 : i32, i32
  }
  func.func @transform_2(%arg0: i32) -> (i32, i32) {
    %c0_i32 = arith.constant 0 : i32
    %c0_i32_0 = arith.constant 0 : i32
    %c0_i32_1 = arith.constant 0 : i32
    return %c0_i32, %c0_i32_0 : i32, i32
  }
  func.func @transform_3(%arg0: i32) -> (i32, i32) {
    %c0_i32 = arith.constant 0 : i32
    %c0_i32_0 = arith.constant 0 : i32
    %c0_i32_1 = arith.constant 0 : i32
    return %c0_i32, %c0_i32_0 : i32, i32
  }
  func.func @transform_4(%arg0: i32) -> (i32, i32) {
    %c0_i32 = arith.constant 0 : i32
    %c0_i32_0 = arith.constant 0 : i32
    %c0_i32_1 = arith.constant 0 : i32
    return %c0_i32, %c0_i32_0 : i32, i32
  }
  func.func @transform_5(%arg0: i32) -> (i32, i32) {
    %c0_i32 = arith.constant 0 : i32
    %c0_i32_0 = arith.constant 0 : i32
    %c0_i32_1 = arith.constant 0 : i32
    return %c0_i32, %c0_i32_0 : i32, i32
  }
  func.func @transform_6(%arg0: i32) -> (i32, i32) {
    %c0_i32 = arith.constant 0 : i32
    %c0_i32_0 = arith.constant 0 : i32
    %c0_i32_1 = arith.constant 0 : i32
    return %c0_i32, %c0_i32_0 : i32, i32
  }
  func.func @transform_7(%arg0: i32) -> (i32, i32) {
    %c0_i32 = arith.constant 0 : i32
    %c0_i32_0 = arith.constant 0 : i32
    %c0_i32_1 = arith.constant 0 : i32
    return %c0_i32, %c0_i32_0 : i32, i32
  }
  func.func @transform_8(%arg0: i32) -> (i32, i32) {
    %c0_i32 = arith.constant 0 : i32
    %c0_i32_0 = arith.constant 0 : i32
    %c0_i32_1 = arith.constant 0 : i32
    return %c0_i32, %c0_i32_0 : i32, i32
  }
  func.func @transform_9(%arg0: i32) -> (i32, i32) {
    %c0_i32 = arith.constant 0 : i32
    %c0_i32_0 = arith.constant 0 : i32
    %c0_i32_1 = arith.constant 0 : i32
    return %c0_i32, %c0_i32_0 : i32, i32
  }
  func.func @transform_10(%arg0: i32) -> (i32, i32) {
    %c0_i32 = arith.constant 0 : i32
    %c0_i32_0 = arith.constant 0 : i32
    %c0_i32_1 = arith.constant 0 : i32
    return %c0_i32, %c0_i32_0 : i32, i32
  }
  func.func @transform_11(%arg0: i32) -> (i32, i32) {
    %c0_i32 = arith.constant 0 : i32
    %c0_i32_0 = arith.constant 0 : i32
    return %c0_i32, %arg0 : i32, i32
  }
}

</mosaic_0001>

<bundles_post_ra>
// kernel: tpu_custom_call.1
= control target key start
LH: loop header
LB: loop body
LE: loop exit
PB: predicated region body
PF: predicated region fallthrough
CT: control target
= control target key end

     0   :  { %s1265_s0 = inlined_call_operand.vmem [shape: f32[8,256], index: 0, kind: input, shape index: {}]   ;;  %s1266_s1 = inlined_call_operand.vmem [shape: f32[32,24], index: 1, kind: input, shape index: {}]   ;;  %s1267_s2 = inlined_call_operand.vmem [shape: f32[32,1], index: 2, kind: input, shape index: {}]   ;;  %s1268_s3 = inlined_call_operand.vmem [shape: f32[16,48], index: 3, kind: input, shape index: {}]   ;;  %s1269_s4 = inlined_call_operand.vmem [shape: f32[16,1], index: 4, kind: input, shape index: {}]   ;;  %s1270_s5 = inlined_call_operand.vmem [shape: f32[4,16], index: 5, kind: input, shape index: {}]   ;;  %s1271_s6 = inlined_call_operand.vmem [shape: f32[4,1], index: 6, kind: input, shape index: {}]   ;;  %s1272_s7 = inlined_call_operand.vmem [shape: f32[4,4], index: 7, kind: input, shape index: {}]   ;;  %s1273_s8 = inlined_call_operand.vmem [shape: f32[4,1], index: 8, kind: input, shape index: {}]   ;;  %s1274_s9 = inlined_call_operand.vmem [shape: f32[128,2], index: 9, kind: input, shape index: {}]   ;;  %s1275_s10 = inlined_call_operand.vmem [shape: f32[2,128], index: 10, kind: input, shape index: {}]   ;;  %s1276_s11 = inlined_call_operand.hbm [shape: f32[16,256], index: 11, kind: output, shape index: {}]  }
   0x1   :  { %1277 = sst [smem:[#allocation5_spill]] %s1265_s0 }
   0x2   :  { %1278 = sst [smem:[#allocation6_spill]] %s1266_s1 }
   0x3   :  { %16 = vsyncpa [#allocation3], 0 }
   0x4   :  { %18 = vsyncpa [#allocation3 + $0x1], 0  ;;  %s1037_s17 = smov 0   ;;  %s1039_s18 = smov 0  }
   0x5   :  { %s1041_s19 = smov 0   ;;  %s1043_s20 = smov 0  }
   0x6 LB: > { %s1058_s21 = sadd.s32 4294967295, %s969_s20   ;;  %s802_s22 = sadd.s32 4294967294, %s969_s20   ;;  %s969_s20 = sphi %s1043_s20, %s1290_s20   ;;  %s965_s19 = sphi %s1041_s19, %s1289_s19   ;;  %s961_s18 = sphi %s1039_s18, %s1288_s18   ;;  %s957_s17 = sphi %s1037_s17, %s1287_s17  }
   0x7   : > { %s1062_s23 = sadd.s32 1, %s969_s20   ;;  %s267_s24 = sadd.s32 1, %s965_s19 }
   0x8   : > { %s264_s25 = ssub.s32 %s969_s20, %s1062_s23  ;;  %p277_p0 = scmp.ne.s32.totalorder %s965_s19, %s961_s18 }
   0x9   : > { %p265_p1 = scmp.eq.s32.totalorder %s264_s25, 0  ;;  %p278_p2 = scmp.eq.s32.totalorder %s1058_s21, 1 }
   0xa   : > { %p283_p3 = scmp.ne.s32.totalorder %s961_s18, %s957_s17  ;;  %p284_p4 = scmp.eq.s32.totalorder %s802_s22, 1 }
   0xb   : > { %s1073_s26 = scalar_select %p265_p1, %s965_s19, %s267_s24  }
   0xc   : > { %p1075_p5 = por %p278_p2, %p277_p0  ;;  %p1079_p6 = por %p284_p4, %p283_p3 }
   0xd   : > { %p805_p7 = scmp.ge.s32.totalorder %s969_s20, 1  ;;  %p339_p8 = scmp.lt.s32.totalorder %s969_s20, 3 }
   0xf   : > { %p340_p9 = pnand %p805_p7, %p339_p8 }
  0x10   : > { %p378_p10 = scmp.lt.s32.totalorder (!%p340_p9), %s1058_s21, 1  ;;  %s1281_s0 = sld [smem:[#allocation5_spill]] (!%p340_p9) }
  0x11   : > { %343 = sbr.rel (%p340_p9) target bundleno = 1133 (0x46d), region = 64  ;;  %s971_s15 = smov (!%p340_p9), 127  }
  0x12   : > { %s972_s16 = smov (!%p340_p9), 1   ;;  %s1286_s1 = sld [smem:[#allocation6_spill]] (!%p340_p9) }
  0x13   : > { %s834_s24 = sshll.u32 (!%p340_p9), %s1058_s21, 3  ;;  %s927_s25 = scalar_lea.hbm (!%p340_p9), %s1276_s11, 32 }
  0x16   : > { %s379_s29 = scalar_select %p378_p10, %s1058_s21, 1  ;;  %v414_v1 = vld [vmem:[%s1267_s2 + $0x8] sm:$0xff]  ;;  %v973_v2 = vmov 0   ;;  %v383_v3 = vlaneseq  ;;  %v413_v4 = vld [vmem:[%s1267_s2] sm:$0xff]  ;;  %vm437_vm2 = vcmask 195584   ;;  %v415_v23 = vld [vmem:[%s1267_s2 + $0x10] sm:$0xff] }
  0x17   : > { %900 = vset.pattern.permute.xlu1 %v973_v2  ;;  %902 = vset.pattern.permute.xlu0 %v973_v2  ;;  %v585_v22 = vld [vmem:[%s1271_s6] sm:$0xf]  ;;  %v496_v26 = vld [vmem:[%s1269_s4 + $0x8] sm:$0xff]  ;;  %v554_v28 = vld [vmem:[%s1274_s9 + $0x78] sm:$0xff]  ;;  %vm507_vm3 = vcmask 392192   ;;  %vm591_vm4 = vcmask 130048  }
  0x18   : > { %s807_s30 = sshll.u32 %s379_s29, 3  ;;  %424 = vperm.xlu1 %900, %v414_v1   ;;  %901 = vset.pattern.permute.xlu2 %v973_v2  ;;  %v384_v5 = vand.u32 127, %v383_v3  ;;  %v399_v10 = vld [vmem:[%s1286_s1] sm:$0xff]  ;;  %v400_v12 = vld [vmem:[%s1286_s1 + $0x8] sm:$0xff]  ;;  %v401_v13 = vld [vmem:[%s1286_s1 + $0x10] sm:$0xff]  ;;  %vm627_vm5 = vcmask 1043456   ;;  %s736_s29 = scalar_lea.hbm %s1276_s11, %s834_s24 }
  0x19   : > { %s381_s14 = scalar_lea.vmem %s1281_s0, %s807_s30  ;;  %v402_v24 = vld [vmem:[%s1286_s1 + $0x18] sm:$0xff]  ;;  %v495_v27 = vld [vmem:[%s1269_s4] sm:$0xff]  ;;  %839 = vmatpush.msra.mxu2 %v554_v28  ;;  %v553_v29 = vld [vmem:[%s1274_s9 + $0x70] sm:$0xff]  ;;  %vm623_vm6 = vcmask 31744   ;;  %vm684_vm7 = vcmask 1041408   ;;  %vm677_vm12 = vcmask 15360  }
  0x1a   : > { %v382_v0 = vld [vmem:[%s381_s14] sm:$0xff]  ;;  %v389_v6 = vand.u32 63, %v384_v5  ;;  %v552_v31 = vld [vmem:[%s1274_s9 + $0x68] sm:$0xff]  ;;  %v550_v34 = vld [vmem:[%s1274_s9 + $0x58] sm:$0xff]  ;;  %s739_s13 = sshll.u32 %s736_s29, 4  ;;  %s740_s13 = int_to_ptr.hbm [resolvable:$true] %s739_s13 }
  0x1b   : > { %408 = vrot.lane.b32.xlu0 %v382_v0, %s971_s15  ;;  %840 = vmatpush.msra.mxu2 %v553_v29  ;;  %v617_v32 = vld [vmem:[%s1273_s8] sm:$0xf]  ;;  %v549_v35 = vld [vmem:[%s1274_s9 + $0x50] sm:$0xff]  ;;  %v548_v36 = vld [vmem:[%s1274_s9 + $0x48] sm:$0xff]  ;;  %s921_s14 = sshra.s32 %s740_s13, 4  ;;  %s922_s14 = int_to_ptr.hbm [resolvable:$true] %s921_s14 }
  0x1c   : > { %vm1098_vm0 = vcmp.ne.s32.totalorder %v389_v6, 31  ;;  %vm1104_vm1 = vcmp.ne.s32.totalorder %v389_v6, 0  ;;  %v551_v33 = vld [vmem:[%s1274_s9 + $0x60] sm:$0xff]  ;;  %v416_v37 = vld [vmem:[%s1267_s2 + $0x18] sm:$0xff]  ;;  %v482_v41 = vld [vmem:[%s1268_s3 + $0x8] sm:$0xff]  ;;  %s923_s0 = scalar_lea.hbm %s922_s14, 16  ;;  %p928_p0 = scmp.lt.s32.totalorder %s922_s14, %s1276_s11 }
  0x1d   : > { %841 = vmatpush.msra.mxu2 %v552_v31  ;;  %v481_v39 = vld [vmem:[%s1268_s3] sm:$0xff]  ;;  %v546_v43 = vld [vmem:[%s1274_s9 + $0x38] sm:$0xff]  ;;  %v545_v44 = vld [vmem:[%s1274_s9 + $0x30] sm:$0xff]  ;;  %p924_p11 = scmp.ne.s32.totalorder %s922_s14, %s923_s0  ;;  %p929_p1 = scmp.lt.s32.totalorder %s927_s25, %s923_s0 }
  0x1e   : > { %v547_v42 = vld [vmem:[%s1274_s9 + $0x40] sm:$0xff]  ;;  %v544_v45 = vld [vmem:[%s1274_s9 + $0x28] sm:$0xff]  ;;  %v542_v47 = vld [vmem:[%s1274_s9 + $0x18] sm:$0xff] }
  0x1f   : > { %842 = vmatpush.msra.mxu2 %v551_v33  ;;  %v543_v46 = vld [vmem:[%s1274_s9 + $0x20] sm:$0xff]  ;;  %v541_v48 = vld [vmem:[%s1274_s9 + $0x10] sm:$0xff]  ;;  %v540_v49 = vld [vmem:[%s1274_s9 + $0x8] sm:$0xff]  ;;  %p925_p12 = pnand %p924_p11, %p1075_p5  ;;  %p930_p2 = por %p929_p1, %p928_p0 }
  0x20   : > { %419 = vperm.xlu1 %900, %v413_v4   ;;  %v539_v50 = vld [vmem:[%s1274_s9] sm:$0xff] }
  0x21   : > { %843 = vmatpush.msra.mxu2 %v550_v34  ;;  %v584_v61 = vld [vmem:[%s1270_s5] sm:$0xf]  ;;  %p926_p13 = pneg %p925_p12 }
  0x22   : > { %v616_v2 = vld [vmem:[%s1272_s7] sm:$0xf] }
  0x23   : > { %403 = vrot.lane.b32.xlu0 %v382_v0, %s972_s16  ;;  %844 = vmatpush.msra.mxu2 %v549_v35  ;;  %v676_v3 = vld [vmem:[%s1275_s10] sm:$0x3]  ;;  %p931_p3 = pnand %p930_p2, %p926_p13 }
  0x25   : > { %845 = vmatpush.msra.mxu2 %v548_v36 }
  0x27   : > { %846 = vmatpush.msra.mxu2 %v547_v42 }
  0x29   : > { %847 = vmatpush.msra.mxu2 %v546_v43 }
  0x2b   : > { %848 = vmatpush.msra.mxu2 %v545_v44 }
  0x2d   : > { %849 = vmatpush.msra.mxu2 %v544_v45 }
  0x2f   : > { %850 = vmatpush.msra.mxu2 %v543_v46 }
  0x31   : > { %851 = vmatpush.msra.mxu2 %v542_v47 }
  0x33   : > { %852 = vmatpush.msra.mxu2 %v541_v48 }
  0x35   : > { %853 = vmatpush.msra.mxu2 %v540_v49 }
  0x37   : > { %854 = vmatpush.msra.mxu2 %v539_v50 }
  0x8a   : > { %v425_v14 = vpop.permute.xlu1 %424 }
  0x8d   : > { %v409_v8 = vpop.permute.xlu0 %408 }
  0x8e   : > { %809 = vmatpush.msk.msra.mxu0 %vm1098_vm0, %v409_v8 }
  0x90   : > { %464 = vmatpush.msra.mxu0 %v382_v0 }
  0x92   : > { %v420_v15 = vpop.permute.xlu1 %419 }
  0x95   : > { %v404_v11 = vpop.permute.xlu0 %403 }
  0x96   : > { %811 = vmatpush.msk.msra.mxu0 %vm1104_vm1, %v404_v11 }
  0x97   : > { %812 = vmatmul.msk.f32.vlgmr.msra.gmra.mxu0 %vm437_vm2, %v399_v10 }
  0x9f   : > { %813 = vmatmul.msk.f32.gmra.mxu0 %vm437_vm2, %v400_v12 }
  0xa7   : > { %814 = vmatmul.msk.f32.gmra.mxu0 %vm437_vm2, %v401_v13 }
  0xaf   : > { %815 = vmatmul.msk.f32.gmra.mxu0 %vm437_vm2, %v402_v24 }
 0x114   : > { %v467_v16 = vpop.f32.mrf.mxu0 }
 0x115   : > { %v468_v17 = vadd.f32 %v467_v16, %v420_v15 }
 0x117   : > { %v479_v18 = vmax.f32 %v468_v17, 0.0 }
 0x119   : > { %483 = vrot.lane.b32.xlu1 %v479_v18, %s972_s16 }
 0x11c   : > { %v470_v19 = vpop.f32.mrf.mxu0 }
 0x11d   : > { %v471_v20 = vadd.f32 %v470_v19, %v425_v14 }
 0x11f   : > { %v480_v21 = vmax.f32 %v471_v20, 0.0 }
 0x121   : > { %485 = vrot.lane.b32.xlu0 %v480_v21, %s972_s16  ;;  %491 = vrot.lane.b32.xlu2 %v480_v21, %s971_s15  ;;  %s375_s16 = sand.u32 1, %s961_s18  }
 0x122   : > { %588 = vperm.xlu1 %900, %v585_v22   ;;  %s806_s22 = sshll.u32 %s375_s16, 4  ;;  %s726_s21 = scalar_lea.sflag [#allocation3], %s375_s16 }
 0x123   : > { %s377_s30 = scalar_lea.vmem [#allocation2], %s806_s22 }
 0x124   : > { %s737_s12 = sshll.u32 %s377_s30, 4  ;;  %s738_s12 = int_to_ptr.vmem [resolvable:$true] %s737_s12 }
 0x129   : > { %489 = vrot.lane.b32.xlu2 %v479_v18, %s971_s15  ;;  %504 = vperm.xlu0 %902, %v496_v26  }
 0x12a   : > { %429 = vperm.xlu1 %900, %v415_v23  }
 0x131   : > { %499 = vperm.xlu2 %901, %v495_v27  }
 0x139   : > { %620 = vperm.xlu2 %901, %v617_v32  }
 0x141   : > { %434 = vperm.xlu2 %901, %v416_v37  }
 0x17b   : > { %v492_v25 = vpop.permute.xlu2 %491 }
 0x17c   : > { %817 = vmatpush.msk.msra.mxu1 %vm1098_vm0, %v492_v25 }
 0x183   : > { %v490_v30 = vpop.permute.xlu2 %489 }
 0x184   : > { %819 = vmatpush.msk.msra.mxu1 %vm1098_vm0, %v490_v30 }
 0x186   : > { %526 = vmatpush.msra.mxu1 %v480_v21 }
 0x188   : > { %527 = vmatpush.msra.mxu1 %v479_v18 }
 0x18b   : > { %v484_v40 = vpop.permute.xlu1 %483  ;;  %v500_v51 = vpop.permute.xlu2 %499 }
 0x193   : > { %v486_v38 = vpop.permute.xlu0 %485  ;;  %v621_v4 = vpop.permute.xlu2 %620 }
 0x194   : > { %821 = vmatpush.msk.msra.mxu1 %vm1104_vm1, %v486_v38  ;;  %v589_v62 = vpop.permute.xlu1 %588 }
 0x196   : > { %823 = vmatpush.msk.msra.mxu1 %vm1104_vm1, %v484_v40 }
 0x197   : > { %824 = vmatmul.msk.f32.vlgmr.msra.gmra.mxu1 %vm507_vm3, %v481_v39 }
 0x198   : > { %555 = vmatpush.msrb.mxu1 %v554_v28 }
 0x19a   : > { %556 = vmatpush.msrb.mxu1 %v553_v29  ;;  %v473_v29 = vpop.f32.mrf.mxu0 }
 0x19b   : > { %v505_v55 = vpop.permute.xlu0 %504  ;;  %v435_v40 = vpop.permute.xlu2 %434 }
 0x19c   : > { %557 = vmatpush.msrb.mxu1 %v552_v31  ;;  %v430_v30 = vpop.permute.xlu1 %429 }
 0x19d   : > { %v474_v32 = vadd.f32 %v473_v29, %v430_v30 }
 0x19e   : > { %558 = vmatpush.msrb.mxu1 %v551_v33 }
 0x19f   : > { %825 = vmatmul.msk.f32.gmra.mxu1 %vm507_vm3, %v482_v41 }
 0x1a0   : > { %559 = vmatpush.msrb.mxu1 %v550_v34 }
 0x1a2   : > { %560 = vmatpush.msrb.mxu1 %v549_v35  ;;  %v476_v39 = vpop.f32.mrf.mxu0 }
 0x1a4   : > { %561 = vmatpush.msrb.mxu1 %v548_v36 }
 0x1a6   : > { %562 = vmatpush.msrb.mxu1 %v547_v42  ;;  %v477_v42 = vadd.f32 %v476_v39, %v435_v40 }
 0x1a8   : > { %563 = vmatpush.msrb.mxu1 %v546_v43 }
 0x1aa   : > { %564 = vmatpush.msrb.mxu1 %v545_v44 }
 0x1ac   : > { %565 = vmatpush.msrb.mxu1 %v544_v45 }
 0x1ae   : > { %566 = vmatpush.msrb.mxu1 %v543_v46 }
 0x1b0   : > { %567 = vmatpush.msrb.mxu1 %v542_v47 }
 0x1b2   : > { %568 = vmatpush.msrb.mxu1 %v541_v48 }
 0x1b4   : > { %569 = vmatpush.msrb.mxu1 %v540_v49 }
 0x1b6   : > { %570 = vmatpush.msrb.mxu1 %v539_v50 }
 0x214   : > { %v531_v52 = vpop.f32.mrf.mxu1 }
 0x215   : > { %v1210_v53 = vadd.f32 %v531_v52, %v500_v51 }
 0x217   : > { %571 = vmatmul.f32.vlgmr.msrb.gmra.mxu1 %v1210_v53  ;;  %v537_v54 = vand.u32 2147483647, %v1210_v53 }
 0x219   : > { %577 = vmatmul.f32.vlgmr.msra.gmra.mxu2 %v537_v54 }
 0x21c   : > { %v534_v56 = vpop.f32.mrf.mxu1 }
 0x21d   : > { %v1214_v57 = vadd.f32 %v534_v56, %v505_v55 }
 0x21f   : > { %574 = vmatmul.f32.gmra.mxu1 %v1214_v57  ;;  %v538_v58 = vand.u32 2147483647, %v1214_v57 }
 0x221   : > { %580 = vmatmul.f32.gmra.mxu2 %v538_v58 }
 0x294   : > { %v572_v59 = vpop.f32.mrf.mxu1 }
 0x29c   : > { %v575_v60 = vpop.f32.mrf.mxu1  ;;  %v578_v20 = vpop.f32.mrf.mxu2 }
 0x29d   : > { %609 = vmatpush.msra.mxu3 %v575_v60 }
 0x29f   : > { %610 = vmatpush.msra.mxu3 %v572_v59 }
 0x2a0   : > { %826 = vmatmul.msk.f32.vlgmr.msra.gmra.mxu3 %vm591_vm4, %v584_v61 }
 0x2a4   : > { %v581_v24 = vpop.f32.mrf.mxu2 }
 0x323   : > { %v612_v63 = vpop.f32.mrf.mxu3 }
 0x324   : > { %v613_v0 = vadd.f32 %v612_v63, %v589_v62 }
 0x326   : > { %v615_v1 = vmax.f32 %v613_v0, 0.0 }
 0x328   : > { %827 = vmatpush.msk.msrb.mxu3 %vm627_vm5, %v615_v1 }
 0x329   : > { %828 = vmatmul.msk.f32.vlgmr.msrb.gmra.mxu3 %vm623_vm6, %v616_v2 }
 0x32a   : > { %830 = vmatpush.msk.msra.mxu3 %vm684_vm7, %v676_v3 }
 0x3ac   : > { %v648_v5 = vpop.f32.mrf.mxu3 }
 0x3ad   : > { %v649_v6 = vadd.f32 %v648_v5, %v621_v4 }
 0x3af   : > { %v829_v7 = vmul.f32 -1.442695, %v649_v6 }
 0x3b1   : > { %903 = vpow2.f32 %v829_v7 }
 0x3b7   : > { %v904_v8 = vpop.eup %903 }
 0x3b8   : > { %v654_v9 = vadd.f32 1.0, %v904_v8 }
 0x3ba   : > { %905 = vrcp.f32 %v654_v9  ;;  %v666_v13 = vand.u32 2147483648, %v654_v9  ;;  %v664_v15 = vand.u32 2147483647, %v654_v9  ;;  %vm660_vm9 = vweird.f32 %v654_v9 }
 0x3bc   : > { %v667_v17 = vor.u32 1.1754944e-38, %v666_v13  ;;  %vm665_vm11 = vcmp.eq.f32.partialorder %v664_v15, 8.507059e+37 }
 0x3c0   : > { %v906_v10 = vpop.eup %905 }
 0x3c1   : > { %v656_v11 = vmul.f32 %v906_v10, %v654_v9  ;;  %vm661_vm8 = vweird.f32 %v906_v10 }
 0x3c2   : > { %vm662_vm10 = vmor %vm660_vm9, %vm661_vm8 }
 0x3c3   : > { %v657_v12 = vsub.f32 1.0, %v656_v11 }
 0x3c5   : > { %v658_v14 = vmul.f32 %v906_v10, %v657_v12 }
 0x3c7   : > { %v659_v16 = vadd.f32 %v906_v10, %v658_v14 }
 0x3c9   : > { %v663_v18 = vsel %vm662_vm10, %v906_v10, %v659_v16 }
 0x3ca   : > { %v668_v19 = vsel %vm665_vm11, %v667_v17, %v663_v18 }
 0x3cb   : > { %v671_v21 = vrot.slane %v668_v19, 4 }
 0x3cd   : > { %v673_v22 = vsel %vm627_vm5, %v668_v19, %v671_v21 }
 0x3ce   : > { %v674_v23 = vmul.f32 %v673_v22, %v578_v20  ;;  %v675_v25 = vmul.f32 %v673_v22, %v581_v24 }
 0x3d0   : > { %831 = vmatmul.msk.f32.vlgmr.msra.gmra.mxu3 %vm677_vm12, %v674_v23 }
 0x3d8   : > { %832 = vmatmul.msk.f32.gmra.mxu3 %vm677_vm12, %v675_v25 }
 0x453   : > { %v705_v26 = vpop.f32.mrf.mxu3 }
 0x454   : > { %v711_v27 = vsub.f32 0.0, %v705_v26 }
 0x456   : > { %v713_v28 = vmax.f32 %v711_v27, %v1210_v53 }
 0x458   : > { %v715_v31 = vmin.f32 %v705_v26, %v713_v28 }
 0x45a   : > { %v717_v33 = vsub.f32 %v1210_v53, %v715_v31 }
 0x45b   : > { %v708_v34 = vpop.f32.mrf.mxu3 }
 0x45c   : > { %v719_v35 = vadd.f32 %v717_v33, %v474_v32  ;;  %v712_v36 = vsub.f32 0.0, %v708_v34 }
 0x45e   : > { %v721_v37 = vmax.f32 %v719_v35, 0.0  ;;  %v714_v38 = vmax.f32 %v712_v36, %v1214_v57 }
 0x460   : > { %723 = vst [vmem:[%s377_s30] sm:$0xff] %v721_v37  ;;  %v716_v41 = vmin.f32 %v708_v34, %v714_v38 }
 0x462   : > { %v718_v43 = vsub.f32 %v1214_v57, %v716_v41 }
 0x464   : > { %v720_v44 = vadd.f32 %v718_v43, %v477_v42 }
 0x466   : > { %v722_v45 = vmax.f32 %v720_v44, 0.0 }
 0x468   : > { %724 = vst [vmem:[%s377_s30 + $0x8] sm:$0xff] %v722_v45 }
 0x469   : > { %934 = shalt.err (!%p931_p3)
}
 0x46a   : > { %s974_s16 = smov 128   ;;  %s975_s29 = smov 256  }
 0x46b   : > { %s976_s30 = smov 8  }
 0x46c   : > { %855 = dma.vmem_to_hbm [thread:$0]  (%p1075_p5), %s738_s12, 256, %s740_s13, %s726_s21, %s974_s16, %s975_s29, %s976_s30  }
 0x46d PF: > { %p861_p4 = scmp.ge.s32.totalorder %s969_s20, 2  ;;  %s754_s22 = sand.u32 1, %s957_s17  }
 0x46e   : > { %s755_s1 = scalar_lea.sflag [#allocation3], %s754_s22 }
 0x46f   : > { %p858_p7 = pnand %p861_p4, %p1079_p6 }
 0x471   : > { %p859_p8 = pneg %p858_p7 }
 0x473   : > { %952 = dma.done.wait (%p859_p8), %s755_s1, 256  }
 0x474   : > { %954 = vsyncadd (%p859_p8), %s755_s1, 4294967040  ;;  %p21_p9 = scmp.ge.s32.totalorder %s1062_s23, 4   ;;  %s1287_s17 = smov %s961_s18 }
 0x475   : > { %s1288_s18 = smov %s965_s19  ;;  %s1289_s19 = smov %s1073_s26 }
 0x476   : > { %s1290_s20 = smov %s1062_s23  ;;  %23 = sbr.rel (!%p21_p9) target bundleno = 6 (0x6), region = 99 }
 0x47b   :  { %761 = vsyncpa [#allocation3], 1 }
 0x47c   :  { %763 = vsyncpa [#allocation3 + $0x1], 1 }

</bundles_post_ra>
